<compile_context>
chip_gen: v6e
topology: v6e:2x2x1
jax: 0.10.0
libtpu: 0.0.40
codegen_flags: <defaults>
</compile_context>

<pallas_src>
import math
import functools

import jax
import jax.numpy as jnp
from jax.experimental import pallas as pl
from jax.experimental.pallas import tpu as pltpu


# ------------------------- fused Pallas kernel (all blocks, one batch shard per grid row) ----

def _fused_encoder_kernel(x_ref,
                          wq_ref, wk_ref, wv_ref, wo_ref,
                          g1_ref, b1_ref,
                          w1_ref, bf1_ref, w2_ref, bf2_ref,
                          g2_ref, b2_ref,
                          o_ref,
                          *, num_heads, d_head, mxu_dtype):
    blk = pl.program_id(1)

    # Block 0: seed the VMEM-resident carry (the output block, which is revisited across the
    # "arbitrary" block axis, so it is only written back to HBM once per batch shard).
    @pl.when(blk == 0)
    def _():
        o_ref[...] = x_ref[...]

    Bs, S, D = o_ref.shape
    H = num_heads * d_head
    BS = Bs * S

    x = o_ref[...].astype(jnp.float32).reshape(BS, D)        # (BS, D)

    def mm(a, b):                                            # MXU matmul, f32 accumulation
        return jnp.dot(a.astype(mxu_dtype), b.astype(mxu_dtype),
                       preferred_element_type=jnp.float32)

    # --- multi-head attention ---
    q = mm(x, wq_ref[0])                                     # (BS, H)
    k = mm(x, wk_ref[0])
    v = mm(x, wv_ref[0])

    q3 = q.reshape(Bs, S, H)
    k3 = k.reshape(Bs, S, H)
    v3 = v.reshape(Bs, S, H)

    def split_heads(t):                                      # (Bs,S,H) -> (nh*Bs, S, dh)
        return jnp.concatenate(
            [t[:, :, h * d_head:(h + 1) * d_head] for h in range(num_heads)], axis=0)

    qh, kh, vh = split_heads(q3), split_heads(k3), split_heads(v3)

    scale = 1.0 / math.sqrt(d_head)
    s = jnp.einsum('bqd,bkd->bqk',
                   qh.astype(mxu_dtype), kh.astype(mxu_dtype),
                   preferred_element_type=jnp.float32) * scale     # (nh*Bs, S, S)
    s = s - jnp.max(s, axis=-1, keepdims=True)
    e = jnp.exp(s)
    w = e * pl.reciprocal(jnp.sum(e, axis=-1, keepdims=True), approx=True)
    ctx = jnp.einsum('bqk,bkd->bqd',
                     w.astype(mxu_dtype), vh.astype(mxu_dtype),
                     preferred_element_type=jnp.float32)           # (nh*Bs, S, dh)

    attn = jnp.concatenate(
        [ctx[h * Bs:(h + 1) * Bs] for h in range(num_heads)], axis=-1)   # (Bs, S, H)
    attn_out = mm(attn.reshape(BS, H), wo_ref[0])                        # (BS, D)

    # --- LayerNorm (single-pass variance: E[x^2] - mu^2) ---
    def layer_norm(z, g, b):
        mu = jnp.mean(z, axis=-1, keepdims=True)
        ex2 = jnp.mean(z * z, axis=-1, keepdims=True)
        var = ex2 - mu * mu
        return (z - mu) * jax.lax.rsqrt(var + 1e-5) * g + b

    r = layer_norm(x + attn_out, g1_ref[0], b1_ref[0])                   # (BS, D)

    # --- feed-forward ---
    h1 = jnp.maximum(mm(r, w1_ref[0]) + bf1_ref[0], 0.0)                 # (BS, F)
    h2 = mm(h1, w2_ref[0]) + bf2_ref[0]                                  # (BS, D)

    y = layer_norm(r + h2, g2_ref[0], b2_ref[0])

    o_ref[...] = y.reshape(Bs, S, D).astype(o_ref.dtype)


# ------------------------- wrapper -------------------------

def encoder_transformer(K, V, Q, blocks_params, *, num_heads,
                        batch_shards=1, mxu_dtype=jnp.float32):
    """K/V/Q: (B, S, input_*). blocks_params: list of per-block weight dicts.
    batch_shards: size of the leading 'parallel' grid axis (use 2 on v7x to fill both TCs)."""
    X = jnp.concatenate((K, V, Q), axis=2)                   # glue, as in the PyTorch forward
    B, S, D = X.shape
    num_blk = len(blocks_params)
    H = blocks_params[0]["wq"].shape[1]
    F = blocks_params[0]["w1"].shape[1]
    assert H % num_heads == 0 and B % batch_shards == 0
    d_head = H // num_heads
    Bs = B // batch_shards

    names = ["wq", "wk", "wv", "wo", "ln1_g", "ln1_b",
             "w1", "b1", "w2", "b2", "ln2_g", "ln2_b"]
    # stack per-block weights along a leading num_blk axis -> streamed per grid step
    weight_args = [jnp.stack([p[n] for p in blocks_params]) for n in names]

    def wspec(arr):
        zeros = (0,) * (arr.ndim - 1)
        return pl.BlockSpec((1,) + arr.shape[1:],
                            lambda bs, i, _z=zeros: (i,) + _z)

    kernel = functools.partial(_fused_encoder_kernel, num_heads=num_heads,
                               d_head=d_head, mxu_dtype=mxu_dtype)

    flops = num_blk * (2 * B * S * D * H * 3          # q, k, v projections
                       + 2 * B * S * S * H * 2        # scores + attn @ V
                       + 2 * B * S * H * D            # output projection
                       + 2 * B * S * D * F * 2)       # FFN
    transcendentals = num_blk * num_heads * B * S * S  # softmax exp
    bytes_accessed = int(2 * X.size * X.dtype.itemsize
                         + sum(w.size * w.dtype.itemsize for w in weight_args))

    return pl.pallas_call(
        kernel,
        out_shape=jax.ShapeDtypeStruct((B, S, D), X.dtype),
        grid_spec=pltpu.PrefetchScalarGridSpec(
            num_scalar_prefetch=0,
            grid=(batch_shards, num_blk),
            in_specs=[pl.BlockSpec((Bs, S, D), lambda bs, i: (bs, 0, 0))]
                     + [wspec(w) for w in weight_args],
            out_specs=pl.BlockSpec((Bs, S, D), lambda bs, i: (bs, 0, 0)),
        ),
        compiler_params=pltpu.CompilerParams(
            dimension_semantics=("parallel", "arbitrary")),
        cost_estimate=pl.CostEstimate(flops=int(flops),
                                      transcendentals=int(transcendentals),
                                      bytes_accessed=bytes_accessed),
    )(X, *weight_args)


# ------------------------- parameter construction (deterministic) -------------------------

def _uniform(key, shape, fan_in):
    bound = 1.0 / math.sqrt(fan_in)
    return jax.random.uniform(key, shape, jnp.float32, -bound, bound)


def init_block_params(key, input_size, hidden_size, dim_feedforward):
    keys = jax.random.split(key, 8)
    D, H, F = input_size, hidden_size, dim_feedforward
    return {
        # attention projections (bias-free), stored (in, out)
        "wq": _uniform(keys[0], (D, H), D),
        "wk": _uniform(keys[1], (D, H), D),
        "wv": _uniform(keys[2], (D, H), D),
        "wo": _uniform(keys[3], (H, D), H),
        # LayerNorm1
        "ln1_g": jnp.ones((1, D), jnp.float32),
        "ln1_b": jnp.zeros((1, D), jnp.float32),
        # FFN
        "w1": _uniform(keys[4], (D, F), D),
        "b1": _uniform(keys[5], (1, F), D),
        "w2": _uniform(keys[6], (F, D), F),
        "b2": _uniform(keys[7], (1, D), F),
        # LayerNorm2
        "ln2_g": jnp.ones((1, D), jnp.float32),
        "ln2_b": jnp.zeros((1, D), jnp.float32),
    }


# ------------------------- pure-JAX reference for sanity check -------------------------

def _ref_block(x, p, num_heads):
    H = p["wq"].shape[1]
    dh = H // num_heads
    q, k, v = x @ p["wq"], x @ p["wk"], x @ p["wv"]
    outs = []
    for h in range(num_heads):
        sl = slice(h * dh, (h + 1) * dh)
        s = jnp.einsum("bqd,bkd->bqk", q[..., sl], k[..., sl]) / math.sqrt(dh)
        w = jax.nn.softmax(s, axis=-1)
        outs.append(jnp.einsum("bqk,bkd->bqd", w, v[..., sl]))
    attn_out = jnp.concatenate(outs, axis=-1) @ p["wo"]

    def ln(z, g, b):
        mu = z.mean(-1, keepdims=True)
        var = ((z - mu) ** 2).mean(-1, keepdims=True)
        return (z - mu) * jax.lax.rsqrt(var + 1e-5) * g + b

    r = ln(x + attn_out, p["ln1_g"], p["ln1_b"])
    ffn = jnp.maximum(r @ p["w1"] + p["b1"], 0.0) @ p["w2"] + p["b2"]
    return ln(r + ffn, p["ln2_g"], p["ln2_b"])


# ------------------------- main -------------------------

if __name__ == "__main__":
    # small shapes consistent with EncoderTransformer.forward
    B, S = 2, 8
    input_k = input_q = input_v = 8
    input_size = input_k + input_q + input_v        # 24
    hidden_size = 32
    num_heads = 4
    dim_feedforward = 64
    num_blk = 2

    root = jax.random.PRNGKey(0)
    kK, kV, kQ, kP = jax.random.split(root, 4)
    K = jax.random.normal(kK, (B, S, input_k), jnp.float32)
    V = jax.random.normal(kV, (B, S, input_v), jnp.float32)
    Q = jax.random.normal(kQ, (B, S, input_q), jnp.float32)

    blk_keys = jax.random.split(kP, num_blk)
    blocks_params = [
        init_block_params(blk_keys[i], input_size, hidden_size, dim_feedforward)
        for i in range(num_blk)
    ]

    # batch_shards=2: size-2 "parallel" leading grid axis so v7x's two TensorCores each run one
    # batch element (use batch_shards=1 on single-TC v5e/v6e to minimize grid-step overhead).
    out = encoder_transformer(K, V, Q, blocks_params, num_heads=num_heads, batch_shards=2)
    out = jax.block_until_ready(out)

    # sanity check against a pure-JAX reference (tolerance loosened slightly because the kernel
    # uses the EUP approximate reciprocal for the softmax normalization)
    x_ref = jnp.concatenate((K, V, Q), axis=2)
    for p in blocks_params:
        x_ref = _ref_block(x_ref, p, num_heads)
    assert out.shape == (B, S, input_size)
    assert jnp.allclose(out, x_ref, atol=1e-2, rtol=1e-2), "mismatch vs reference"

    print("KERNEL_OK")
</pallas_src>

<mosaic_0001>
module attributes {stable_mosaic.version = 11 : i64} {
  func.func @_fused_encoder_kernel(%arg0: i32, %arg1: i32, %arg2: memref<1x8x24xf32, #tpu.memory_space<vmem>>, %arg3: memref<1x24x32xf32, #tpu.memory_space<vmem>>, %arg4: memref<1x24x32xf32, #tpu.memory_space<vmem>>, %arg5: memref<1x24x32xf32, #tpu.memory_space<vmem>>, %arg6: memref<1x32x24xf32, #tpu.memory_space<vmem>>, %arg7: memref<1x1x24xf32, #tpu.memory_space<vmem>>, %arg8: memref<1x1x24xf32, #tpu.memory_space<vmem>>, %arg9: memref<1x24x64xf32, #tpu.memory_space<vmem>>, %arg10: memref<1x1x64xf32, #tpu.memory_space<vmem>>, %arg11: memref<1x64x24xf32, #tpu.memory_space<vmem>>, %arg12: memref<1x1x24xf32, #tpu.memory_space<vmem>>, %arg13: memref<1x1x24xf32, #tpu.memory_space<vmem>>, %arg14: memref<1x1x24xf32, #tpu.memory_space<vmem>>, %arg15: memref<1x8x24xf32, #tpu.memory_space<vmem>>) attributes {dimension_semantics = [#tpu.dimension_semantics<parallel>, #tpu.dimension_semantics<arbitrary>], iteration_bounds = array<i64: 2, 2>, scalar_prefetch = 0 : i64, scratch_operands = 0 : i64, tpu.core_type = #tpu.core_type<tc>, window_params = [{transform_indices = @transform_0, window_bounds = array<i64: 1, 8, 24>}, {transform_indices = @transform_1, window_bounds = array<i64: 1, 24, 32>}, {transform_indices = @transform_2, window_bounds = array<i64: 1, 24, 32>}, {transform_indices = @transform_3, window_bounds = array<i64: 1, 24, 32>}, {transform_indices = @transform_4, window_bounds = array<i64: 1, 32, 24>}, {transform_indices = @transform_5, window_bounds = array<i64: 1, 1, 24>}, {transform_indices = @transform_6, window_bounds = array<i64: 1, 1, 24>}, {transform_indices = @transform_7, window_bounds = array<i64: 1, 24, 64>}, {transform_indices = @transform_8, window_bounds = array<i64: 1, 1, 64>}, {transform_indices = @transform_9, window_bounds = array<i64: 1, 64, 24>}, {transform_indices = @transform_10, window_bounds = array<i64: 1, 1, 24>}, {transform_indices = @transform_11, window_bounds = array<i64: 1, 1, 24>}, {transform_indices = @transform_12, window_bounds = array<i64: 1, 1, 24>}, {transform_indices = @transform_13, window_bounds = array<i64: 1, 8, 24>}]} {
    %c0_i32 = arith.constant 0 : i32
    %0 = arith.cmpi eq, %arg1, %c0_i32 : i32
    %1 = arith.extui %0 : i1 to i32
    %c0_i32_0 = arith.constant 0 : i32
    %2 = arith.cmpi ne, %1, %c0_i32_0 : i32
    scf.if %2 {
      %c0_63 = arith.constant 0 : index
      %c0_64 = arith.constant 0 : index
      %c0_65 = arith.constant 0 : index
      %127 = vector.load %arg2[%c0_63, %c0_64, %c0_65] : memref<1x8x24xf32, #tpu.memory_space<vmem>>, vector<1x8x24xf32>
      %c0_66 = arith.constant 0 : index
      %c0_67 = arith.constant 0 : index
      %c0_68 = arith.constant 0 : index
      %128 = vector.load %arg15[%c0_66, %c0_67, %c0_68] : memref<1x8x24xf32, #tpu.memory_space<vmem>>, vector<1x8x24xf32>
      tpu.vector_store %arg15[%c0_66, %c0_67, %c0_68], %127 {strides = array<i32>} : memref<1x8x24xf32, #tpu.memory_space<vmem>>, vector<1x8x24xf32>,
    } else {
    }
    %c0 = arith.constant 0 : index
    %c0_1 = arith.constant 0 : index
    %c0_2 = arith.constant 0 : index
    %3 = vector.load %arg15[%c0, %c0_1, %c0_2] : memref<1x8x24xf32, #tpu.memory_space<vmem>>, vector<1x8x24xf32>
    %4 = vector.shape_cast %3 : vector<1x8x24xf32> to vector<8x24xf32>
    %c0_3 = arith.constant 0 : index
    %c0_4 = arith.constant 0 : index
    %c0_5 = arith.constant 0 : index
    %5 = vector.load %arg3[%c0_3, %c0_4, %c0_5] : memref<1x24x32xf32, #tpu.memory_space<vmem>>, vector<1x24x32xf32>
    %6 = vector.shape_cast %5 : vector<1x24x32xf32> to vector<24x32xf32>
    %cst = arith.constant dense<0.000000e+00> : vector<8x32xf32>
    %7 = tpu.matmul %4, %6, %cst {dimension_numbers = #tpu.dot_dimension_numbers<[1], [0], [0], [1], [0, 0, 1, 1], [], []>} : vector<8x24xf32>, vector<24x32xf32>, vector<8x32xf32> -> vector<8x32xf32>
    %c0_6 = arith.constant 0 : index
    %c0_7 = arith.constant 0 : index
    %c0_8 = arith.constant 0 : index
    %8 = vector.load %arg4[%c0_6, %c0_7, %c0_8] : memref<1x24x32xf32, #tpu.memory_space<vmem>>, vector<1x24x32xf32>
    %9 = vector.shape_cast %8 : vector<1x24x32xf32> to vector<24x32xf32>
    %cst_9 = arith.constant dense<0.000000e+00> : vector<8x32xf32>
    %10 = tpu.matmul %4, %9, %cst_9 {dimension_numbers = #tpu.dot_dimension_numbers<[1], [0], [0], [1], [0, 0, 1, 1], [], []>} : vector<8x24xf32>, vector<24x32xf32>, vector<8x32xf32> -> vector<8x32xf32>
    %c0_10 = arith.constant 0 : index
    %c0_11 = arith.constant 0 : index
    %c0_12 = arith.constant 0 : index
    %11 = vector.load %arg5[%c0_10, %c0_11, %c0_12] : memref<1x24x32xf32, #tpu.memory_space<vmem>>, vector<1x24x32xf32>
    %12 = vector.shape_cast %11 : vector<1x24x32xf32> to vector<24x32xf32>
    %cst_13 = arith.constant dense<0.000000e+00> : vector<8x32xf32>
    %13 = tpu.matmul %4, %12, %cst_13 {dimension_numbers = #tpu.dot_dimension_numbers<[1], [0], [0], [1], [0, 0, 1, 1], [], []>} : vector<8x24xf32>, vector<24x32xf32>, vector<8x32xf32> -> vector<8x32xf32>
    %14 = vector.shape_cast %7 : vector<8x32xf32> to vector<1x8x32xf32>
    %15 = vector.shape_cast %10 : vector<8x32xf32> to vector<1x8x32xf32>
    %16 = vector.shape_cast %13 : vector<8x32xf32> to vector<1x8x32xf32>
    %17 = vector.extract_strided_slice %14 {offsets = [0, 0, 0], sizes = [1, 8, 8], strides = [1, 1, 1]} : vector<1x8x32xf32> to vector<1x8x8xf32>
    %18 = vector.extract_strided_slice %14 {offsets = [0, 0, 8], sizes = [1, 8, 8], strides = [1, 1, 1]} : vector<1x8x32xf32> to vector<1x8x8xf32>
    %19 = vector.extract_strided_slice %14 {offsets = [0, 0, 16], sizes = [1, 8, 8], strides = [1, 1, 1]} : vector<1x8x32xf32> to vector<1x8x8xf32>
    %20 = vector.extract_strided_slice %14 {offsets = [0, 0, 24], sizes = [1, 8, 8], strides = [1, 1, 1]} : vector<1x8x32xf32> to vector<1x8x8xf32>
    %21 = tpu.concatenate %17, %18, %19, %20 in 0 : vector<1x8x8xf32>, vector<1x8x8xf32>, vector<1x8x8xf32>, vector<1x8x8xf32> -> vector<4x8x8xf32>
    %22 = vector.extract_strided_slice %15 {offsets = [0, 0, 0], sizes = [1, 8, 8], strides = [1, 1, 1]} : vector<1x8x32xf32> to vector<1x8x8xf32>
    %23 = vector.extract_strided_slice %15 {offsets = [0, 0, 8], sizes = [1, 8, 8], strides = [1, 1, 1]} : vector<1x8x32xf32> to vector<1x8x8xf32>
    %24 = vector.extract_strided_slice %15 {offsets = [0, 0, 16], sizes = [1, 8, 8], strides = [1, 1, 1]} : vector<1x8x32xf32> to vector<1x8x8xf32>
    %25 = vector.extract_strided_slice %15 {offsets = [0, 0, 24], sizes = [1, 8, 8], strides = [1, 1, 1]} : vector<1x8x32xf32> to vector<1x8x8xf32>
    %26 = tpu.concatenate %22, %23, %24, %25 in 0 : vector<1x8x8xf32>, vector<1x8x8xf32>, vector<1x8x8xf32>, vector<1x8x8xf32> -> vector<4x8x8xf32>
    %27 = vector.extract_strided_slice %16 {offsets = [0, 0, 0], sizes = [1, 8, 8], strides = [1, 1, 1]} : vector<1x8x32xf32> to vector<1x8x8xf32>
    %28 = vector.extract_strided_slice %16 {offsets = [0, 0, 8], sizes = [1, 8, 8], strides = [1, 1, 1]} : vector<1x8x32xf32> to vector<1x8x8xf32>
    %29 = vector.extract_strided_slice %16 {offsets = [0, 0, 16], sizes = [1, 8, 8], strides = [1, 1, 1]} : vector<1x8x32xf32> to vector<1x8x8xf32>
    %30 = vector.extract_strided_slice %16 {offsets = [0, 0, 24], sizes = [1, 8, 8], strides = [1, 1, 1]} : vector<1x8x32xf32> to vector<1x8x8xf32>
    %31 = tpu.concatenate %27, %28, %29, %30 in 0 : vector<1x8x8xf32>, vector<1x8x8xf32>, vector<1x8x8xf32>, vector<1x8x8xf32> -> vector<4x8x8xf32>
    "tpu.trace_start"() <{level = 10 : i32, message = "bqd,bkd->bqk"}> : () -> ()
    %cst_14 = arith.constant dense<0.000000e+00> : vector<4x8x8xf32>
    %32 = tpu.matmul %21, %26, %cst_14 {dimension_numbers = #tpu.dot_dimension_numbers<[2], [2], [1], [1], [0, 0, 0, 1, 1, 1], [0], [0]>} : vector<4x8x8xf32>, vector<4x8x8xf32>, vector<4x8x8xf32> -> vector<4x8x8xf32>
    "tpu.trace_stop"() : () -> ()
    %cst_15 = arith.constant 0.353553385 : f32
    %33 = vector.broadcast %cst_15 : f32 to vector<4x8x8xf32>
    %34 = arith.mulf %32, %33 : vector<4x8x8xf32>
    %cst_16 = arith.constant dense<0xFF800000> : vector<4x8xf32>
    %35 = vector.multi_reduction <maximumf>, %34, %cst_16 [2] : vector<4x8x8xf32> to vector<4x8xf32>
    %36 = vector.shape_cast %35 : vector<4x8xf32> to vector<4x8x1xf32>
    %37 = vector.broadcast %36 : vector<4x8x1xf32> to vector<4x8x8xf32>
    %38 = arith.subf %34, %37 : vector<4x8x8xf32>
    %39 = math.exp %38 : vector<4x8x8xf32>
    %cst_17 = arith.constant dense<0.000000e+00> : vector<4x8xf32>
    %40 = vector.multi_reduction <add>, %39, %cst_17 [2] : vector<4x8x8xf32> to vector<4x8xf32>
    %41 = vector.shape_cast %40 : vector<4x8xf32> to vector<4x8x1xf32>
    %42 = tpu.reciprocal %41 {approx = true} : vector<4x8x1xf32> -> vector<4x8x1xf32>
    %43 = vector.broadcast %42 : vector<4x8x1xf32> to vector<4x8x8xf32>
    %44 = arith.mulf %39, %43 : vector<4x8x8xf32>
    "tpu.trace_start"() <{level = 10 : i32, message = "bqk,bkd->bqd"}> : () -> ()
    %cst_18 = arith.constant dense<0.000000e+00> : vector<4x8x8xf32>
    %45 = tpu.matmul %44, %31, %cst_18 {dimension_numbers = #tpu.dot_dimension_numbers<[2], [1], [1], [2], [0, 0, 0, 1, 1, 2], [0], [0]>} : vector<4x8x8xf32>, vector<4x8x8xf32>, vector<4x8x8xf32> -> vector<4x8x8xf32>
    "tpu.trace_stop"() : () -> ()
    %46 = vector.extract_strided_slice %45 {offsets = [0, 0, 0], sizes = [1, 8, 8], strides = [1, 1, 1]} : vector<4x8x8xf32> to vector<1x8x8xf32>
    %47 = vector.extract_strided_slice %45 {offsets = [1, 0, 0], sizes = [1, 8, 8], strides = [1, 1, 1]} : vector<4x8x8xf32> to vector<1x8x8xf32>
    %48 = vector.extract_strided_slice %45 {offsets = [2, 0, 0], sizes = [1, 8, 8], strides = [1, 1, 1]} : vector<4x8x8xf32> to vector<1x8x8xf32>
    %49 = vector.extract_strided_slice %45 {offsets = [3, 0, 0], sizes = [1, 8, 8], strides = [1, 1, 1]} : vector<4x8x8xf32> to vector<1x8x8xf32>
    %50 = tpu.concatenate %46, %47, %48, %49 in 2 : vector<1x8x8xf32>, vector<1x8x8xf32>, vector<1x8x8xf32>, vector<1x8x8xf32> -> vector<1x8x32xf32>
    %51 = vector.shape_cast %50 : vector<1x8x32xf32> to vector<8x32xf32>
    %c0_19 = arith.constant 0 : index
    %c0_20 = arith.constant 0 : index
    %c0_21 = arith.constant 0 : index
    %52 = vector.load %arg6[%c0_19, %c0_20, %c0_21] : memref<1x32x24xf32, #tpu.memory_space<vmem>>, vector<1x32x24xf32>
    %53 = vector.shape_cast %52 : vector<1x32x24xf32> to vector<32x24xf32>
    %cst_22 = arith.constant dense<0.000000e+00> : vector<8x24xf32>
    %54 = tpu.matmul %51, %53, %cst_22 {dimension_numbers = #tpu.dot_dimension_numbers<[1], [0], [0], [1], [0, 0, 1, 1], [], []>} : vector<8x32xf32>, vector<32x24xf32>, vector<8x24xf32> -> vector<8x24xf32>
    %55 = arith.addf %4, %54 : vector<8x24xf32>
    %c0_23 = arith.constant 0 : index
    %c0_24 = arith.constant 0 : index
    %c0_25 = arith.constant 0 : index
    %56 = vector.load %arg7[%c0_23, %c0_24, %c0_25] : memref<1x1x24xf32, #tpu.memory_space<vmem>>, vector<1x1x24xf32>
    %57 = vector.shape_cast %56 : vector<1x1x24xf32> to vector<1x24xf32>
    %c0_26 = arith.constant 0 : index
    %c0_27 = arith.constant 0 : index
    %c0_28 = arith.constant 0 : index
    %58 = vector.load %arg8[%c0_26, %c0_27, %c0_28] : memref<1x1x24xf32, #tpu.memory_space<vmem>>, vector<1x1x24xf32>
    %59 = vector.shape_cast %58 : vector<1x1x24xf32> to vector<1x24xf32>
    %cst_29 = arith.constant dense<0.000000e+00> : vector<8xf32>
    %60 = vector.multi_reduction <add>, %55, %cst_29 [1] : vector<8x24xf32> to vector<8xf32>
    %61 = vector.shape_cast %60 : vector<8xf32> to vector<8x1xf32>
    %cst_30 = arith.constant 2.400000e+01 : f32
    %62 = vector.broadcast %cst_30 : f32 to vector<8x1xf32>
    %63 = arith.divf %61, %62 : vector<8x1xf32>
    %64 = arith.mulf %55, %55 : vector<8x24xf32>
    %cst_31 = arith.constant dense<0.000000e+00> : vector<8xf32>
    %65 = vector.multi_reduction <add>, %64, %cst_31 [1] : vector<8x24xf32> to vector<8xf32>
    %66 = vector.shape_cast %65 : vector<8xf32> to vector<8x1xf32>
    %cst_32 = arith.constant 2.400000e+01 : f32
    %67 = vector.broadcast %cst_32 : f32 to vector<8x1xf32>
    %68 = arith.divf %66, %67 : vector<8x1xf32>
    %69 = arith.mulf %63, %63 : vector<8x1xf32>
    %70 = arith.subf %68, %69 : vector<8x1xf32>
    %71 = vector.broadcast %63 : vector<8x1xf32> to vector<8x24xf32>
    %72 = arith.subf %55, %71 : vector<8x24xf32>
    %cst_33 = arith.constant 9.99999974E-6 : f32
    %73 = vector.broadcast %cst_33 : f32 to vector<8x1xf32>
    %74 = arith.addf %70, %73 : vector<8x1xf32>
    %75 = math.rsqrt %74 : vector<8x1xf32>
    %76 = vector.broadcast %75 : vector<8x1xf32> to vector<8x24xf32>
    %77 = arith.mulf %72, %76 : vector<8x24xf32>
    %78 = vector.broadcast %57 : vector<1x24xf32> to vector<8x24xf32>
    %79 = arith.mulf %77, %78 : vector<8x24xf32>
    %80 = vector.broadcast %59 : vector<1x24xf32> to vector<8x24xf32>
    %81 = arith.addf %79, %80 : vector<8x24xf32>
    %c0_34 = arith.constant 0 : index
    %c0_35 = arith.constant 0 : index
    %c0_36 = arith.constant 0 : index
    %82 = vector.load %arg9[%c0_34, %c0_35, %c0_36] : memref<1x24x64xf32, #tpu.memory_space<vmem>>, vector<1x24x64xf32>
    %83 = vector.shape_cast %82 : vector<1x24x64xf32> to vector<24x64xf32>
    %cst_37 = arith.constant dense<0.000000e+00> : vector<8x64xf32>
    %84 = tpu.matmul %81, %83, %cst_37 {dimension_numbers = #tpu.dot_dimension_numbers<[1], [0], [0], [1], [0, 0, 1, 1], [], []>} : vector<8x24xf32>, vector<24x64xf32>, vector<8x64xf32> -> vector<8x64xf32>
    %c0_38 = arith.constant 0 : index
    %c0_39 = arith.constant 0 : index
    %c0_40 = arith.constant 0 : index
    %85 = vector.load %arg10[%c0_38, %c0_39, %c0_40] : memref<1x1x64xf32, #tpu.memory_space<vmem>>, vector<1x1x64xf32>
    %86 = vector.shape_cast %85 : vector<1x1x64xf32> to vector<1x64xf32>
    %87 = vector.broadcast %86 : vector<1x64xf32> to vector<8x64xf32>
    %88 = arith.addf %84, %87 : vector<8x64xf32>
    %cst_41 = arith.constant 0.000000e+00 : f32
    %89 = vector.broadcast %cst_41 : f32 to vector<8x64xf32>
    %90 = arith.maximumf %88, %89 : vector<8x64xf32>
    %c0_42 = arith.constant 0 : index
    %c0_43 = arith.constant 0 : index
    %c0_44 = arith.constant 0 : index
    %91 = vector.load %arg11[%c0_42, %c0_43, %c0_44] : memref<1x64x24xf32, #tpu.memory_space<vmem>>, vector<1x64x24xf32>
    %92 = vector.shape_cast %91 : vector<1x64x24xf32> to vector<64x24xf32>
    %cst_45 = arith.constant dense<0.000000e+00> : vector<8x24xf32>
    %93 = tpu.matmul %90, %92, %cst_45 {dimension_numbers = #tpu.dot_dimension_numbers<[1], [0], [0], [1], [0, 0, 1, 1], [], []>} : vector<8x64xf32>, vector<64x24xf32>, vector<8x24xf32> -> vector<8x24xf32>
    %c0_46 = arith.constant 0 : index
    %c0_47 = arith.constant 0 : index
    %c0_48 = arith.constant 0 : index
    %94 = vector.load %arg12[%c0_46, %c0_47, %c0_48] : memref<1x1x24xf32, #tpu.memory_space<vmem>>, vector<1x1x24xf32>
    %95 = vector.shape_cast %94 : vector<1x1x24xf32> to vector<1x24xf32>
    %96 = vector.broadcast %95 : vector<1x24xf32> to vector<8x24xf32>
    %97 = arith.addf %93, %96 : vector<8x24xf32>
    %98 = arith.addf %81, %97 : vector<8x24xf32>
    %c0_49 = arith.constant 0 : index
    %c0_50 = arith.constant 0 : index
    %c0_51 = arith.constant 0 : index
    %99 = vector.load %arg13[%c0_49, %c0_50, %c0_51] : memref<1x1x24xf32, #tpu.memory_space<vmem>>, vector<1x1x24xf32>
    %100 = vector.shape_cast %99 : vector<1x1x24xf32> to vector<1x24xf32>
    %c0_52 = arith.constant 0 : index
    %c0_53 = arith.constant 0 : index
    %c0_54 = arith.constant 0 : index
    %101 = vector.load %arg14[%c0_52, %c0_53, %c0_54] : memref<1x1x24xf32, #tpu.memory_space<vmem>>, vector<1x1x24xf32>
    %102 = vector.shape_cast %101 : vector<1x1x24xf32> to vector<1x24xf32>
    %cst_55 = arith.constant dense<0.000000e+00> : vector<8xf32>
    %103 = vector.multi_reduction <add>, %98, %cst_55 [1] : vector<8x24xf32> to vector<8xf32>
    %104 = vector.shape_cast %103 : vector<8xf32> to vector<8x1xf32>
    %cst_56 = arith.constant 2.400000e+01 : f32
    %105 = vector.broadcast %cst_56 : f32 to vector<8x1xf32>
    %106 = arith.divf %104, %105 : vector<8x1xf32>
    %107 = arith.mulf %98, %98 : vector<8x24xf32>
    %cst_57 = arith.constant dense<0.000000e+00> : vector<8xf32>
    %108 = vector.multi_reduction <add>, %107, %cst_57 [1] : vector<8x24xf32> to vector<8xf32>
    %109 = vector.shape_cast %108 : vector<8xf32> to vector<8x1xf32>
    %cst_58 = arith.constant 2.400000e+01 : f32
    %110 = vector.broadcast %cst_58 : f32 to vector<8x1xf32>
    %111 = arith.divf %109, %110 : vector<8x1xf32>
    %112 = arith.mulf %106, %106 : vector<8x1xf32>
    %113 = arith.subf %111, %112 : vector<8x1xf32>
    %114 = vector.broadcast %106 : vector<8x1xf32> to vector<8x24xf32>
    %115 = arith.subf %98, %114 : vector<8x24xf32>
    %cst_59 = arith.constant 9.99999974E-6 : f32
    %116 = vector.broadcast %cst_59 : f32 to vector<8x1xf32>
    %117 = arith.addf %113, %116 : vector<8x1xf32>
    %118 = math.rsqrt %117 : vector<8x1xf32>
    %119 = vector.broadcast %118 : vector<8x1xf32> to vector<8x24xf32>
    %120 = arith.mulf %115, %119 : vector<8x24xf32>
    %121 = vector.broadcast %100 : vector<1x24xf32> to vector<8x24xf32>
    %122 = arith.mulf %120, %121 : vector<8x24xf32>
    %123 = vector.broadcast %102 : vector<1x24xf32> to vector<8x24xf32>
    %124 = arith.addf %122, %123 : vector<8x24xf32>
    %125 = vector.shape_cast %124 : vector<8x24xf32> to vector<1x8x24xf32>
    %c0_60 = arith.constant 0 : index
    %c0_61 = arith.constant 0 : index
    %c0_62 = arith.constant 0 : index
    %126 = vector.load %arg15[%c0_60, %c0_61, %c0_62] : memref<1x8x24xf32, #tpu.memory_space<vmem>>, vector<1x8x24xf32>
    tpu.vector_store %arg15[%c0_60, %c0_61, %c0_62], %125 {strides = array<i32>} : memref<1x8x24xf32, #tpu.memory_space<vmem>>, vector<1x8x24xf32>,
    return
  }
  func.func @transform_0(%arg0: i32, %arg1: i32) -> (i32, i32, i32) {
    %c0_i32 = arith.constant 0 : i32
    %c0_i32_0 = arith.constant 0 : i32
    %c0_i32_1 = arith.constant 0 : i32
    return %arg0, %c0_i32, %c0_i32_0 : i32, i32, i32
  }
  func.func @transform_1(%arg0: i32, %arg1: i32) -> (i32, i32, i32) {
    %c0_i32 = arith.constant 0 : i32
    %c0_i32_0 = arith.constant 0 : i32
    %c0_i32_1 = arith.constant 0 : i32
    return %arg1, %c0_i32, %c0_i32_0 : i32, i32, i32
  }
  func.func @transform_2(%arg0: i32, %arg1: i32) -> (i32, i32, i32) {
    %c0_i32 = arith.constant 0 : i32
    %c0_i32_0 = arith.constant 0 : i32
    %c0_i32_1 = arith.constant 0 : i32
    return %arg1, %c0_i32, %c0_i32_0 : i32, i32, i32
  }
  func.func @transform_3(%arg0: i32, %arg1: i32) -> (i32, i32, i32) {
    %c0_i32 = arith.constant 0 : i32
    %c0_i32_0 = arith.constant 0 : i32
    %c0_i32_1 = arith.constant 0 : i32
    return %arg1, %c0_i32, %c0_i32_0 : i32, i32, i32
  }
  func.func @transform_4(%arg0: i32, %arg1: i32) -> (i32, i32, i32) {
    %c0_i32 = arith.constant 0 : i32
    %c0_i32_0 = arith.constant 0 : i32
    %c0_i32_1 = arith.constant 0 : i32
    return %arg1, %c0_i32, %c0_i32_0 : i32, i32, i32
  }
  func.func @transform_5(%arg0: i32, %arg1: i32) -> (i32, i32, i32) {
    %c0_i32 = arith.constant 0 : i32
    %c0_i32_0 = arith.constant 0 : i32
    %c0_i32_1 = arith.constant 0 : i32
    return %arg1, %c0_i32, %c0_i32_0 : i32, i32, i32
  }
  func.func @transform_6(%arg0: i32, %arg1: i32) -> (i32, i32, i32) {
    %c0_i32 = arith.constant 0 : i32
    %c0_i32_0 = arith.constant 0 : i32
    %c0_i32_1 = arith.constant 0 : i32
    return %arg1, %c0_i32, %c0_i32_0 : i32, i32, i32
  }
  func.func @transform_7(%arg0: i32, %arg1: i32) -> (i32, i32, i32) {
    %c0_i32 = arith.constant 0 : i32
    %c0_i32_0 = arith.constant 0 : i32
    %c0_i32_1 = arith.constant 0 : i32
    return %arg1, %c0_i32, %c0_i32_0 : i32, i32, i32
  }
  func.func @transform_8(%arg0: i32, %arg1: i32) -> (i32, i32, i32) {
    %c0_i32 = arith.constant 0 : i32
    %c0_i32_0 = arith.constant 0 : i32
    %c0_i32_1 = arith.constant 0 : i32
    return %arg1, %c0_i32, %c0_i32_0 : i32, i32, i32
  }
  func.func @transform_9(%arg0: i32, %arg1: i32) -> (i32, i32, i32) {
    %c0_i32 = arith.constant 0 : i32
    %c0_i32_0 = arith.constant 0 : i32
    %c0_i32_1 = arith.constant 0 : i32
    return %arg1, %c0_i32, %c0_i32_0 : i32, i32, i32
  }
  func.func @transform_10(%arg0: i32, %arg1: i32) -> (i32, i32, i32) {
    %c0_i32 = arith.constant 0 : i32
    %c0_i32_0 = arith.constant 0 : i32
    %c0_i32_1 = arith.constant 0 : i32
    return %arg1, %c0_i32, %c0_i32_0 : i32, i32, i32
  }
  func.func @transform_11(%arg0: i32, %arg1: i32) -> (i32, i32, i32) {
    %c0_i32 = arith.constant 0 : i32
    %c0_i32_0 = arith.constant 0 : i32
    %c0_i32_1 = arith.constant 0 : i32
    return %arg1, %c0_i32, %c0_i32_0 : i32, i32, i32
  }
  func.func @transform_12(%arg0: i32, %arg1: i32) -> (i32, i32, i32) {
    %c0_i32 = arith.constant 0 : i32
    %c0_i32_0 = arith.constant 0 : i32
    %c0_i32_1 = arith.constant 0 : i32
    return %arg1, %c0_i32, %c0_i32_0 : i32, i32, i32
  }
  func.func @transform_13(%arg0: i32, %arg1: i32) -> (i32, i32, i32) {
    %c0_i32 = arith.constant 0 : i32
    %c0_i32_0 = arith.constant 0 : i32
    %c0_i32_1 = arith.constant 0 : i32
    return %arg0, %c0_i32, %c0_i32_0 : i32, i32, i32
  }
}

</mosaic_0001>

<bundles_post_ra>
// kernel: tpu_custom_call.1
= control target key start
LH: loop header
LB: loop body
LE: loop exit
PB: predicated region body
PF: predicated region fallthrough
CT: control target
= control target key end

     0   :  { %s2910_s0 = inlined_call_operand.vmem [shape: f32[2,8,24], index: 0, kind: input, shape index: {}]   ;;  %s2911_s1 = inlined_call_operand.vmem [shape: f32[2,24,32], index: 1, kind: input, shape index: {}]   ;;  %s2912_s2 = inlined_call_operand.vmem [shape: f32[2,24,32], index: 2, kind: input, shape index: {}]   ;;  %s2913_s3 = inlined_call_operand.vmem [shape: f32[2,24,32], index: 3, kind: input, shape index: {}]   ;;  %s2914_s4 = inlined_call_operand.vmem [shape: f32[2,32,24], index: 4, kind: input, shape index: {}]   ;;  %s2915_s5 = inlined_call_operand.vmem [shape: f32[2,1,24], index: 5, kind: input, shape index: {}]   ;;  %s2916_s6 = inlined_call_operand.vmem [shape: f32[2,1,24], index: 6, kind: input, shape index: {}]   ;;  %s2917_s7 = inlined_call_operand.vmem [shape: f32[2,24,64], index: 7, kind: input, shape index: {}]   ;;  %s2918_s8 = inlined_call_operand.vmem [shape: f32[2,1,64], index: 8, kind: input, shape index: {}]   ;;  %s2919_s9 = inlined_call_operand.vmem [shape: f32[2,64,24], index: 9, kind: input, shape index: {}]   ;;  %s2920_s10 = inlined_call_operand.vmem [shape: f32[2,1,24], index: 10, kind: input, shape index: {}]   ;;  %s2921_s11 = inlined_call_operand.vmem [shape: f32[2,1,24], index: 11, kind: input, shape index: {}]   ;;  %s2922_s12 = inlined_call_operand.vmem [shape: f32[2,1,24], index: 12, kind: input, shape index: {}]   ;;  %s2923_s13 = inlined_call_operand.hbm [shape: f32[2,8,24], index: 13, kind: output, shape index: {}]  }
   0x1   :  { %2939 = sst [smem:[#allocation18_spill]] %s2910_s0 }
   0x2   :  { %2940 = sst [smem:[#allocation19_spill]] %s2911_s1 }
   0x3   :  { %2941 = sst [smem:[#allocation20_spill]] %s2912_s2 }
   0x4   :  { %2942 = sst [smem:[#allocation21_spill]] %s2913_s3 }
   0x5   :  { %2943 = sst [smem:[#allocation22_spill]] %s2914_s4 }
   0x6   :  { %2944 = sst [smem:[#allocation23_spill]] %s2917_s7 }
   0x7   :  { %2945 = sst [smem:[#allocation24_spill]] %s2922_s12 }
   0x8   :  { %2946 = sst [smem:[#allocation25_spill]] %s2923_s13 }
   0x9   :  { %18 = vsyncpa [#allocation3], 0 }
   0xa   :  { %20 = vsyncpa [#allocation3 + $0x1], 0  ;;  %s2558_s25 = smov 0   ;;  %s2560_s26 = smov 0  }
   0xb   :  { %s2562_s27 = smov 0   ;;  %s2564_s28 = smov 0  }
   0xc   :  { %s2566_s29 = smov 0   ;;  %s2568_s30 = smov 0  }
   0xd   :  { %s2570_s14 = smov 0   ;;  %s2572_s15 = smov 0  }
   0xe LB: > { %2947 = sst [smem:[#allocation5_spill]] %s2449_s25  ;;  %s2087_s16 = sadd.s32 4294967295, %s2477_s15   ;;  %s2477_s15 = sphi %s2572_s15, %s26_s15   ;;  %s2473_s14 = sphi %s2570_s14, %s2987_s14   ;;  %s2469_s30 = sphi %s2568_s30, %s2986_s30   ;;  %s2465_s29 = sphi %s2566_s29, %s2985_s29   ;;  %s2461_s28 = sphi %s2564_s28, %s2984_s28   ;;  %s2457_s27 = sphi %s2562_s27, %s2983_s27   ;;  %s2453_s26 = sphi %s2560_s26, %s2982_s26   ;;  %s2449_s25 = sphi %s2558_s25, %s2981_s25  }
   0xf   : > { %2948 = sst [smem:[#allocation6_spill]] %s2453_s26  ;;  %s2088_s17 = sadd.s32 4294967294, %s2477_s15  }
  0x10   : > { %2949 = sst [smem:[#allocation7_spill]] %s2457_s27  ;;  %s35_s18 = sadd.s32 1, %s2469_s30 }
  0x11   : > { %2950 = sst [smem:[#allocation8_spill]] %s2461_s28  ;;  %p36_p0 = scmp.ge.s32.totalorder %s35_s18, 2 }
  0x12   : > { %2951 = sst [smem:[#allocation9_spill]] %s2465_s29  ;;  %s38_s19 = sadd.s32 1, %s2473_s14 }
  0x13   : > { %2952 = sst [smem:[#allocation10_spill]] %s2469_s30  ;;  %p393_p1 = scmp.ne.s32.totalorder %s2457_s27, %s2453_s26 }
  0x14   : > { %2953 = sst [smem:[#allocation11_spill]] %s2473_s14  ;;  %p394_p2 = scmp.eq.s32.totalorder %s2087_s16, 3 }
  0x15   : > { %2954 = sst [smem:[#allocation12_spill]] %s2477_s15  ;;  %s2989_s18 = smov (%p36_p0, %s35_s18), 0 }
  0x16   : > { %2955 = sst [smem:[#allocation13_spill]] %s2989_s18  ;;  %s2991_s19 = smov (!%p36_p0, %s38_s19), %s2473_s14 }
  0x17   : > { %p2607_p3 = por %p394_p2, %p393_p1  ;;  %p399_p4 = scmp.ne.s32.totalorder %s2453_s26, %s2449_s25 }
  0x18   : > { %p40_p5 = scmp.ge.s32.totalorder %s2991_s19, 2  ;;  %p400_p6 = scmp.eq.s32.totalorder %s2088_s17, 3 }
  0x19   : > { %s2956_s20 = scalar_select %p2607_p3, 1, 0 }
  0x1a   : > { %p2091_p7 = scmp.ge.s32.totalorder %s2477_s15, 1  ;;  %p509_p8 = scmp.lt.s32.totalorder %s2477_s15, 5 }
  0x1b   : > { %2957 = sst [smem:[#allocation14_spill]] %s2956_s20  ;;  %s2993_s19 = smov (%p40_p5, %s2991_s19), 0 }
  0x1c   : > { %2958 = sst [smem:[#allocation15_spill]] %s2993_s19  ;;  %p2617_p9 = por %p400_p6, %p399_p4 }
  0x1d   : > { %p510_p10 = pnand %p2091_p7, %p509_p8  ;;  %s380_s22 = ssub.s32 %s2473_s14, %s2993_s19 }
  0x1e   : > { %s2959_s21 = scalar_select %p2617_p9, 1, 0 }
  0x1f   : > { %s383_s23 = sadd.s32 1, %s2457_s27  ;;  %p381_p11 = scmp.eq.s32.totalorder %s380_s22, 0 }
  0x20   : > { %2960 = sst [smem:[#allocation16_spill]] %s2959_s21  ;;  %513 = sbr.rel (%p510_p10) target bundleno = 2144 (0x860), region = 72 }
  0x21   : > { %s2625_s24 = scalar_select %p381_p11, %s2457_s27, %s383_s23  }
  0x22   : > { %s2927_s16 = sand.u32 (!%p510_p10), 1, %s2453_s26   ;;  %p600_p12 = scmp.lt.s32.totalorder (!%p510_p10), %s2465_s29, 1 }
  0x23   : > { %2961 = sst [smem:[#allocation17_spill]] %s2625_s24  ;;  %s2092_s17 = sshll.u32 (!%p510_p10), %s2927_s16, 3 }
  0x24   : > { %p604_p13 = scmp.lt.s32.totalorder (!%p510_p10), %s2461_s28, 1  ;;  %s2962_s0 = sld [smem:[#allocation18_spill]] (!%p510_p10) }
  0x25   : > { %s601_s18 = scalar_select %p600_p12, %s2465_s29, 1 }
  0x26   : > { %s2634_s30 = scalar_select %p604_p13, %s2461_s28, 1 }
  0x27   : > { %s2093_s22 = sshll.u32 %s601_s18, 3  ;;  %s2963_s1 = sld [smem:[#allocation19_spill]] }
  0x28   : > { %s2285_s24 = smul.u32 24, %s2634_s30  ;;  %s2131_s16 = sshll.u32 %s2634_s30, 5 }
  0x29   : > { %s2964_s2 = sld [smem:[#allocation20_spill]]  ;;  %s637_s12 = scalar_lea.vmem %s2918_s8, %s2634_s30 }
  0x2a   : > { %s603_s14 = scalar_lea.vmem %s2962_s0, %s2093_s22  ;;  %s2965_s3 = sld [smem:[#allocation21_spill]] }
  0x2b   : > { %s2966_s4 = sld [smem:[#allocation22_spill]]  ;;  %s2132_s28 = sshll.u32 %s2634_s30, 6 }
  0x2c   : > { %s2967_s7 = sld [smem:[#allocation23_spill]]  ;;  %s2680_s22 = scalar_lea.vmem %s2919_s9, %s2132_s28 }
  0x2d   : > { %s2648_s20 = scalar_lea.vmem %s2963_s1, %s2285_s24  ;;  %s645_s27 = scalar_lea.vmem %s2920_s10, %s2634_s30 }
  0x2e   : > { %s648_s25 = scalar_lea.vmem %s2921_s11, %s2634_s30  ;;  %s2694_s26 = scalar_lea.vmem [#allocation2], %s2092_s17 }
  0x2f   : > { %s613_s18 = scalar_lea.vmem %s2964_s2, %s2285_s24  ;;  %s2969_s29 = sld [smem:[#allocation8_spill]] }
  0x30   : > { %s2656_s19 = scalar_lea.vmem %s2965_s3, %s2285_s24 }
  0x31   : > { %s2661_s0 = scalar_lea.vmem %s2966_s4, %s2131_s16  ;;  %s2968_s4 = sld [smem:[#allocation24_spill]] }
  0x32   : > { %s2670_s1 = scalar_lea.vmem %s2967_s7, %s2285_s24 }
  0x35   : > { %p2102_p0 = scmp.ne.s32.totalorder %s2969_s29, 0 }
  0x37   : > { %s651_s7 = scalar_lea.vmem %s2968_s4, %s2634_s30  ;;  %655 = sbr.rel (%p2102_p0) target bundleno = 62 (0x3e), region = 76 }
  0x3c   : > { %v656_v0 = vld [vmem:[%s603_s14] sm:$0xff]  ;;  %vm657_vm0 = vcmask 195584  }
  0x3d   : > { %658 = vst.msk [vmem:[%s2694_s26] sm:$0xff] %vm657_vm0, %v656_v0 }
  0x3e PF: > { %v739_v1 = vld [vmem:[%s613_s18 + $0x10] sm:$0xff]  ;;  %v2479_v3 = vmov 0.0   ;;  %v738_v4 = vld [vmem:[%s613_s18 + $0x8] sm:$0xff]  ;;  %v737_v6 = vld [vmem:[%s613_s18] sm:$0xff]  ;;  %vm663_vm1 = vcmask 195584   ;;  %vm2480_vm2 = vmmov 0   ;;  %s2970_s18 = scalar_lea.vmem %s2915_s5, %s2634_s30  ;;  %s2971_s28 = scalar_lea.vmem %s2916_s6, %s2634_s30 }
  0x3f   : > { %v662_v2 = vld [vmem:[%s2648_s20 + $0x10] sm:$0xff]  ;;  %2188 = vmatprep.subr.mxu1 %v2479_v3  ;;  %2179 = vmatprep.subr.mxu0 %v2479_v3  ;;  %v661_v5 = vld [vmem:[%s2648_s20 + $0x8] sm:$0xff]  ;;  %v660_v8 = vld [vmem:[%s2648_s20] sm:$0xff]  ;;  %vm907_vm3 = vcmask 64512   ;;  %s2481_s2 = smov 112   ;;  %s2482_s3 = smov 120  }
  0x40   : > { %2189 = vmatpush3.msra.mxu1 %v739_v1  ;;  %2180 = vmatpush3.msra.mxu0 %v662_v2  ;;  %v812_v9 = vld [vmem:[%s2656_s19 + $0x10] sm:$0xff]  ;;  %v811_v10 = vld [vmem:[%s2656_s19 + $0x8] sm:$0xff]  ;;  %v810_v11 = vld [vmem:[%s2656_s19] sm:$0xff]  ;;  %s2483_s4 = smov 104   ;;  %s2484_s14 = smov 8   ;;  %vm1557_vm4 = vcmask 130048  }
  0x41   : > { %2190 = vmatprep.subr.mxu1 %v2479_v3  ;;  %2181 = vmatprep.subr.mxu0 %v2479_v3  ;;  %s2485_s20 = smov 16   ;;  %s2486_s17 = smov 24   ;;  %vm1564_vm5 = vcmask 261120   ;;  %vm1770_vm6 = vcmask 523264  }
  0x42   : > { %2191 = vmatpush3.msra.mxu1 %v738_v4  ;;  %2182 = vmatpush3.msra.mxu0 %v661_v5  ;;  %s2487_s30 = smov [#allocation2]  }
  0x43   : > { %2192 = vmatprep.subr.mxu1 %v2479_v3  ;;  %2194 = vmatprep.mubr.msk.f32.mxu1 %vm2480_vm2, %v2479_v3 }
  0x44   : > { %v2705_v7 = vld [vmem:[%s2694_s26] sm:$0xff]  ;;  %2193 = vmatpush3.msra.mxu1 %v737_v6  ;;  %2183 = vmatprep.subr.mxu0 %v2479_v3 }
  0x45   : > { %2195 = vmatmul.mubr.msk.f32.vlgmr.msra.gmra.mxu1 %vm663_vm1, %v2705_v7  ;;  %2184 = vmatpush3.msra.mxu0 %v660_v8 }
  0x46   : > { %2185 = vmatprep.mubr.msk.f32.mxu0 %vm2480_vm2, %v2479_v3  ;;  %2206 = vmatprep.subr.mxu1 %v2479_v3 }
  0x47   : > { %2186 = vmatmul.mubr.msk.f32.vlgmr.msra.gmra.mxu0 %vm663_vm1, %v2705_v7  ;;  %2208 = vmatprep.mubr.msk.f32.mxu1 %vm2480_vm2, %v2479_v3 }
  0x48   : > { %2197 = vmatprep.subr.mxu0 %v2479_v3  ;;  %2203 = vmatprep.mubr.msk.f32.mxu0 %vm2480_vm2, %v2479_v3 }
  0x49   : > { %2198 = vmatpush3.msra.mxu0 %v812_v9 }
  0x4a   : > { %2199 = vmatprep.subr.mxu0 %v2479_v3 }
  0x4b   : > { %2200 = vmatpush3.msra.mxu0 %v811_v10 }
  0x4c   : > { %2201 = vmatprep.subr.mxu0 %v2479_v3 }
  0x4d   : > { %2202 = vmatpush3.msra.mxu0 %v810_v11 }
  0x4e   : > { %2216 = vmatprep.subr.mxu0 %v2479_v3  ;;  %2204 = vmatmul.mubr.msk.f32.vlgmr.msra.gmra.mxu0 %vm663_vm1, %v2705_v7 }
  0x4f   : > { %2218 = vmatprep.mubr.msk.f32.mxu0 %vm2480_vm2, %v2479_v3 }
 0x105   : > { %v806_v12 = vpop.f32.mrf.mxu1 }
 0x106   : > { %893 = vrot.lane.b32.xlu1 %v806_v12, %s2481_s2  ;;  %891 = vrot.lane.b32.xlu0 %v806_v12, %s2482_s3 }
 0x107   : > { %2207 = vmatpush3.xpose.msk.msra.mxu1 %vm907_vm3, %v806_v12  ;;  %v733_v13 = vpop.f32.mrf.mxu0  ;;  %v2196_v14 = vpop.f32.mrf.mxu1 }
 0x108   : > { %2211 = vmatprep.subr.mxu1 %v2479_v3 }
 0x109   : > { %v2187_v15 = vpop.f32.mrf.mxu0 }
 0x10a   : > { %2209 = vmatmul.mubr.msk.f32.vlgmr.msra.gmra.mxu1 %vm907_vm3, %v733_v13  ;;  %895 = vrot.lane.b32.xlu1 %v806_v12, %s2483_s4  ;;  %v1563_v15 = vld [vmem:[%s2661_s0 + $0x18] sm:$0xff] }
 0x10b   : > { %884 = vrot.lane.b32.xlu0 %v733_v13, %s2482_s3  ;;  %2213 = vmatprep.mubr.msk.f32.mxu1 %vm2480_vm2, %v2479_v3 }
 0x10e   : > { %888 = vrot.lane.b32.xlu1 %v733_v13, %s2483_s4  ;;  %v2745_v16 = vpop.f32.mrf.mxu0 }
 0x10f   : > { %886 = vrot.lane.b32.xlu0 %v733_v13, %s2481_s2 }
 0x110   : > { %v2205_v17 = vpop.f32.mrf.mxu0 }
 0x111   : > { %v1561_v17 = vld [vmem:[%s2661_s0 + $0x8] sm:$0xff] }
 0x178   : > { %v894_v18 = vpop.permute.xlu1 %893  ;;  %v892_v19 = vpop.permute.xlu0 %891 }
 0x179   : > { %2212 = vmatpush3.xpose.msk.msra.mxu1 %vm907_vm3, %v892_v19  ;;  %2217 = vmatpush3.xpose.msk.msra.mxu0 %vm907_vm3, %v894_v18  ;;  %v1560_v18 = vld [vmem:[%s2661_s0] sm:$0xff] }
 0x17a   : > { %2221 = vmatprep.subr.mxu1 %v2479_v3  ;;  %2226 = vmatprep.subr.mxu0 %v2479_v3 }
 0x17c   : > { %v896_v20 = vpop.permute.xlu1 %895 }
 0x17d   : > { %v885_v21 = vpop.permute.xlu0 %884 }
 0x17e   : > { %2214 = vmatmul.mubr.msk.f32.vlgmr.msra.gmra.mxu1 %vm907_vm3, %v885_v21 }
 0x17f   : > { %2222 = vmatpush3.xpose.msk.msra.mxu1 %vm907_vm3, %v896_v20  ;;  %2223 = vmatprep.mubr.msk.f32.mxu1 %vm2480_vm2, %v2479_v3 }
 0x180   : > { %v889_v22 = vpop.permute.xlu1 %888  ;;  %2231 = vmatprep.subr.mxu1 %v2479_v3 }
 0x181   : > { %v887_v23 = vpop.permute.xlu0 %886 }
 0x182   : > { %2219 = vmatmul.mubr.msk.f32.vlgmr.msra.gmra.mxu0 %vm907_vm3, %v887_v23  ;;  %2224 = vmatmul.mubr.msk.f32.vlgmr.msra.gmra.mxu1 %vm907_vm3, %v889_v22 }
 0x183   : > { %2227 = vmatpush3.msra.mxu0 %v2745_v16  ;;  %2228 = vmatprep.mubr.msk.f32.mxu0 %vm2480_vm2, %v2479_v3 }
 0x184   : > { %2236 = vmatprep.subr.mxu0 %v2479_v3  ;;  %2233 = vmatprep.mubr.msk.f32.mxu1 %vm2480_vm2, %v2479_v3 }
 0x1ca   : > { %v978_v24 = vpop.f32.mrf.mxu1 }
 0x1cb   : > { %v1204_v25 = vmul.f32 0.35355338, %v978_v24 }
 0x1cc   : > { %v2210_v26 = vpop.f32.mrf.mxu1 }
 0x1cd   : > { %v1208_v27 = vsel %vm907_vm3, %v1204_v25, -inf }
 0x1ce   : > { %1209 = vmax.xlane.f32.xlu0 %v1208_v27 }
 0x23e   : > { %v1052_v28 = vpop.f32.mrf.mxu1 }
 0x23f   : > { %v1205_v29 = vmul.f32 0.35355338, %v1052_v28 }
 0x240   : > { %v2215_v30 = vpop.f32.mrf.mxu1 }
 0x241   : > { %v1211_v31 = vsel %vm907_vm3, %v1205_v29, -inf }
 0x242   : > { %1212 = vmax.xlane.f32.xlu1 %v1211_v31  ;;  %v1126_v32 = vpop.f32.mrf.mxu0  ;;  %v1200_v33 = vpop.f32.mrf.mxu1 }
 0x243   : > { %v1206_v34 = vmul.f32 0.35355338, %v1126_v32  ;;  %v1207_v37 = vmul.f32 0.35355338, %v1200_v33 }
 0x244   : > { %v2220_v35 = vpop.f32.mrf.mxu0  ;;  %v2225_v36 = vpop.f32.mrf.mxu1 }
 0x245   : > { %v1214_v38 = vsel %vm907_vm3, %v1206_v34, -inf  ;;  %v1217_v39 = vsel %vm907_vm3, %v1207_v37, -inf }
 0x246   : > { %1215 = vmax.xlane.f32.xlu0 %v1214_v38  ;;  %v1672_v38 = vld [vmem:[%s2670_s1 + $0x8] sm:$0xff] }
 0x24a   : > { %1218 = vmax.xlane.f32.xlu0 %v1217_v39  ;;  %v1671_v39 = vld [vmem:[%s2670_s1] sm:$0xff] }
 0x253   : > { %898 = vrot.lane.b32.xlu1 %v2745_v16, %s2482_s3 }
 0x257   : > { %v1210_v40 = vpop.xlane.xlu0 %1209 }
 0x258   : > { %v1220_v41 = vsub.f32 %v1204_v25, %v1210_v40  ;;  %v1761_v40 = vld [vmem:[%s2680_s22 + $0x30] sm:$0xff] }
 0x25a   : > { %v1224_v42 = vmul.f32 1.442695, %v1220_v41  ;;  %v1760_v41 = vld [vmem:[%s2680_s22 + $0x28] sm:$0xff] }
 0x25c   : > { %2365 = vpow2.f32 %v1224_v42  ;;  %v1759_v42 = vld [vmem:[%s2680_s22 + $0x20] sm:$0xff] }
 0x269   : > { %v2366_v43 = vpop.eup %2365 }
 0x26a   : > { %v1232_v44 = vsel %vm907_vm3, %v2366_v43, 0.0 }
 0x277   : > { %1233 = vadd.xlane.f32.xlu1 %v1232_v44 }
 0x2cb   : > { %v1213_v45 = vpop.xlane.xlu1 %1212 }
 0x2cc   : > { %v1221_v46 = vsub.f32 %v1205_v29, %v1213_v45 }
 0x2ce   : > { %v1226_v47 = vmul.f32 1.442695, %v1221_v46 }
 0x2cf   : > { %v899_v48 = vpop.permute.xlu1 %898  ;;  %v1216_v49 = vpop.xlane.xlu0 %1215 }
 0x2d0   : > { %2367 = vpow2.f32 %v1226_v47  ;;  %v1222_v50 = vsub.f32 %v1206_v34, %v1216_v49  ;;  %2232 = vmatpush3.msra.mxu1 %v899_v48 }
 0x2d1   : > { %2241 = vmatprep.subr.mxu1 %v2479_v3 }
 0x2d2   : > { %v1228_v51 = vmul.f32 1.442695, %v1222_v50 }
 0x2d3   : > { %v1219_v52 = vpop.xlane.xlu0 %1218 }
 0x2d4   : > { %2369 = vpow2.f32 %v1228_v51  ;;  %v1223_v53 = vsub.f32 %v1207_v37, %v1219_v52  ;;  %v1673_v37 = vld [vmem:[%s2670_s1 + $0x10] sm:$0xff]  ;;  %s2976_s1 = sld [smem:[#allocation25_spill]] }
 0x2d6   : > { %v1230_v54 = vmul.f32 1.442695, %v1223_v53  ;;  %v2119_v53 = vld [vmem:[%s2970_s18] ss:$0 sm:$0xff] }
 0x2d8   : > { %2371 = vpow2.f32 %v1230_v54 }
 0x2dd   : > { %v2368_v55 = vpop.eup %2367 }
 0x2de   : > { %v1235_v56 = vsel %vm907_vm3, %v2368_v55, 0.0 }
 0x2df   : > { %1236 = vadd.xlane.f32.xlu0 %v1235_v56 }
 0x2e1   : > { %v2370_v57 = vpop.eup %2369 }
 0x2e2   : > { %v1238_v58 = vsel %vm907_vm3, %v2370_v57, 0.0 }
 0x2e3   : > { %1239 = vadd.xlane.f32.xlu1 %v1238_v58  ;;  %v1757_v58 = vld [vmem:[%s2680_s22 + $0x10] sm:$0xff] }
 0x2e5   : > { %v2372_v59 = vpop.eup %2371 }
 0x2e6   : > { %v1241_v60 = vsel %vm907_vm3, %v2372_v59, 0.0 }
 0x2e7   : > { %1242 = vadd.xlane.f32.xlu0 %v1241_v60  ;;  %v1755_v60 = vld [vmem:[%s2680_s22] sm:$0xff] }
 0x2f4   : > { %904 = vrot.lane.b32.xlu1 %v2745_v16, %s2483_s4 }
 0x2fd   : > { %901 = vrot.lane.b32.xlu0 %v2745_v16, %s2481_s2  ;;  %v1562_v16 = vld [vmem:[%s2661_s0 + $0x10] sm:$0xff] }
 0x300   : > { %v1234_v61 = vpop.xlane.xlu1 %1233 }
 0x301   : > { %2373 = vrcp.f32 %v1234_v61  ;;  %v2121_v61 = vld [vmem:[%s637_s12] ss:$0 sm:$0xff]  ;;  %s2972_s12 = sld [smem:[#allocation9_spill]] }
 0x30e   : > { %v2374_v62 = vpop.eup %2373 }
 0x30f   : > { %v1248_v63 = vmul.f32 %v2374_v62, %v2366_v43  ;;  %v1758_v43 = vld [vmem:[%s2680_s22 + $0x18] sm:$0xff] }
 0x311   : > { %2229 = vmatmul.mubr.msk.f32.vlgmr.msra.gmra.mxu0 %vm907_vm3, %v1248_v63 }
 0x312   : > { %2238 = vmatprep.mubr.msk.f32.mxu0 %vm2480_vm2, %v2479_v3 }
 0x368   : > { %v1237_v0 = vpop.xlane.xlu0 %1236 }
 0x369   : > { %2375 = vrcp.f32 %v1237_v0 }
 0x36c   : > { %v1240_v1 = vpop.xlane.xlu1 %1239 }
 0x36d   : > { %2377 = vrcp.f32 %v1240_v1 }
 0x370   : > { %v1243_v2 = vpop.xlane.xlu0 %1242  ;;  %v905_v8 = vpop.permute.xlu1 %904 }
 0x371   : > { %2379 = vrcp.f32 %v1243_v2  ;;  %v2123_v2 = vld [vmem:[%s645_s27] ss:$0 sm:$0xff] }
 0x374   : > { %v902_v4 = vpop.permute.xlu0 %901 }
 0x375   : > { %2237 = vmatpush3.msra.mxu0 %v902_v4 }
 0x376   : > { %v2376_v5 = vpop.eup %2375  ;;  %2266 = vmatprep.subr.mxu0 %v2479_v3 }
 0x377   : > { %v1249_v6 = vmul.f32 %v2376_v5, %v2368_v55  ;;  %v2120_v55 = vld [vmem:[%s2971_s28] ss:$0 sm:$0xff] }
 0x379   : > { %2234 = vmatmul.mubr.msk.f32.vlgmr.msra.gmra.mxu1 %vm907_vm3, %v1249_v6 }
 0x37a   : > { %v2378_v9 = vpop.eup %2377  ;;  %2242 = vmatpush3.msra.mxu1 %v905_v8  ;;  %2243 = vmatprep.mubr.msk.f32.mxu1 %vm2480_vm2, %v2479_v3 }
 0x37b   : > { %v1250_v10 = vmul.f32 %v2378_v9, %v2370_v57  ;;  %2246 = vmatprep.subr.mxu1 %v2479_v3 }
 0x37d   : > { %2239 = vmatmul.mubr.msk.f32.vlgmr.msra.gmra.mxu0 %vm907_vm3, %v1250_v10 }
 0x37e   : > { %v2380_v11 = vpop.eup %2379  ;;  %2282 = vmatprep.mubr.msk.f32.mxu0 %vm2480_vm2, %v2479_v3 }
 0x37f   : > { %v1251_v12 = vmul.f32 %v2380_v11, %v2372_v59  ;;  %v1756_v59 = vld [vmem:[%s2680_s22 + $0x8] sm:$0xff] }
 0x381   : > { %2244 = vmatmul.mubr.msk.f32.vlgmr.msra.gmra.mxu1 %vm907_vm3, %v1251_v12 }
 0x382   : > { %2254 = vmatprep.mubr.msk.f32.mxu1 %vm2480_vm2, %v2479_v3  ;;  %2247 = vmatpush3.msra.mxu1 %v1563_v15 }
 0x383   : > { %2248 = vmatprep.subr.mxu1 %v2479_v3 }
 0x384   : > { %2249 = vmatpush3.msra.mxu1 %v1562_v16 }
 0x385   : > { %2250 = vmatprep.subr.mxu1 %v2479_v3 }
 0x386   : > { %2251 = vmatpush3.msra.mxu1 %v1561_v17 }
 0x387   : > { %2252 = vmatprep.subr.mxu1 %v2479_v3 }
 0x388   : > { %2253 = vmatpush3.msra.mxu1 %v1560_v18 }
 0x389   : > { %2257 = vmatprep.subr.mxu1 %v2479_v3 }
 0x3d1   : > { %v1321_v13 = vpop.f32.mrf.mxu0 }
 0x3d3   : > { %v2230_v14 = vpop.f32.mrf.mxu0 }
 0x439   : > { %v1394_v19 = vpop.f32.mrf.mxu1 }
 0x43a   : > { %1545 = vrot.lane.b32.xlu1 %v1394_v19, %s2484_s14  ;;  %s2128_s14 = sshll.u32 %s2972_s12, 7 }
 0x43b   : > { %v2235_v20 = vpop.f32.mrf.mxu1  ;;  %s1889_s18 = scalar_lea.hbm %s2976_s1, %s2128_s14 }
 0x43c   : > { %v2125_v20 = vld [vmem:[%s648_s25] ss:$0 sm:$0xff] }
 0x43d   : > { %v1467_v21 = vpop.f32.mrf.mxu0 }
 0x43e   : > { %1549 = vrot.lane.b32.xlu0 %v1467_v21, %s2485_s20  ;;  %s1891_s20 = sshll.u32 %s2694_s26, 4  ;;  %s1892_s20 = int_to_ptr.vmem [resolvable:$true] %s1891_s20 }
 0x43f   : > { %v2240_v22 = vpop.f32.mrf.mxu0  ;;  %s2385_s25 = scalar_lea.vmem %s1892_s20, 128 }
 0x440   : > { %v2126_v22 = vld [vmem:[%s651_s7] ss:$0 sm:$0xff]  ;;  %p2386_p1 = scmp.ne.s32.totalorder %s1892_s20, %s2385_s25  ;;  %s2389_s7 = sshll.u32 %s2487_s30, 4  ;;  %s2390_s7 = int_to_ptr.vmem [resolvable:$false] %s2389_s7 }
 0x441   : > { %v1540_v23 = vpop.f32.mrf.mxu1  ;;  %s2391_s28 = scalar_lea.vmem %s2390_s7, 256  ;;  %p2392_p5 = scmp.lt.s32.totalorder %s1892_s20, %s2390_s7 }
 0x442   : > { %1553 = vrot.lane.b32.xlu1 %v1540_v23, %s2486_s17  ;;  %p2387_p2 = pnand %p2386_p1, %p2607_p3  ;;  %p2393_p6 = scmp.lt.s32.totalorder %s2391_s28, %s2385_s25 }
 0x443   : > { %v2245_v24 = vpop.f32.mrf.mxu1 }
 0x444   : > { %p2388_p4 = pneg %p2387_p2  ;;  %p2394_p7 = por %p2393_p6, %p2392_p5 }
 0x446   : > { %p2395_p8 = pnand %p2394_p7, %p2388_p4 }
 0x4ac   : > { %v1546_v25 = vpop.permute.xlu1 %1545 }
 0x4ad   : > { %v1556_v27 = vsel %vm907_vm3, %v1321_v13, %v1546_v25 }
 0x4b0   : > { %v1550_v26 = vpop.permute.xlu0 %1549 }
 0x4b1   : > { %v1558_v28 = vsel %vm1557_vm4, %v1556_v27, %v1550_v26 }
 0x4b4   : > { %v1554_v29 = vpop.permute.xlu1 %1553 }
 0x4b5   : > { %v1559_v30 = vsel %vm663_vm1, %v1558_v28, %v1554_v29 }
 0x4b6   : > { %2255 = vmatmul.mubr.msk.f32.vlgmr.msra.gmra.mxu1 %vm1564_vm5, %v1559_v30 }
 0x4b7   : > { %2263 = vmatprep.mubr.msk.f32.mxu1 %vm2480_vm2, %v2479_v3  ;;  %2258 = vmatpush3.msra.mxu1 %v1673_v37 }
 0x4b8   : > { %2259 = vmatprep.subr.mxu1 %v2479_v3 }
 0x4b9   : > { %2260 = vmatpush3.msra.mxu1 %v1672_v38 }
 0x4ba   : > { %2261 = vmatprep.subr.mxu1 %v2479_v3 }
 0x4bb   : > { %2262 = vmatpush3.msra.mxu1 %v1671_v39 }
 0x576   : > { %v1634_v31 = vpop.f32.mrf.mxu1 }
 0x577   : > { %v1638_v32 = vadd.f32 %v1634_v31, %v2705_v7  ;;  %v1762_v7 = vld [vmem:[%s2680_s22 + $0x38] sm:$0xff]  ;;  %s2973_s22 = sld [smem:[#allocation6_spill]] }
 0x578   : > { %v2256_v33 = vpop.f32.mrf.mxu1  ;;  %2267 = vmatpush3.msra.mxu0 %v1762_v7 }
 0x579   : > { %v1641_v34 = vsel %vm663_vm1, %v1638_v32, 0.0  ;;  %v1646_v35 = vmul.f32 %v1638_v32, %v1638_v32  ;;  %2268 = vmatprep.subr.mxu0 %v2479_v3 }
 0x57a   : > { %1642 = vadd.xlane.f32.xlu0 %v1641_v34  ;;  %2269 = vmatpush3.msra.mxu0 %v1761_v40 }
 0x57b   : > { %v1647_v36 = vsel %vm663_vm1, %v1646_v35, 0.0  ;;  %2270 = vmatprep.subr.mxu0 %v2479_v3 }
 0x57c   : > { %1648 = vadd.xlane.f32.xlu1 %v1647_v36  ;;  %2271 = vmatpush3.msra.mxu0 %v1760_v41 }
 0x57d   : > { %2272 = vmatprep.subr.mxu0 %v2479_v3  ;;  %s2977_s19 = sand.u32 1, %s2973_s22  }
 0x57e   : > { %2273 = vmatpush3.msra.mxu0 %v1759_v42  ;;  %s1878_s13 = scalar_lea.sflag [#allocation3], %s2977_s19 }
 0x57f   : > { %2274 = vmatprep.subr.mxu0 %v2479_v3 }
 0x580   : > { %2275 = vmatpush3.msra.mxu0 %v1758_v43 }
 0x581   : > { %2276 = vmatprep.subr.mxu0 %v2479_v3 }
 0x582   : > { %2277 = vmatpush3.msra.mxu0 %v1757_v58 }
 0x583   : > { %2278 = vmatprep.subr.mxu0 %v2479_v3 }
 0x584   : > { %2279 = vmatpush3.msra.mxu0 %v1756_v59 }
 0x585   : > { %2280 = vmatprep.subr.mxu0 %v2479_v3 }
 0x586   : > { %2281 = vmatpush3.msra.mxu0 %v1755_v60 }
 0x603   : > { %v1643_v44 = vpop.xlane.xlu0 %1642 }
 0x604   : > { %v1645_v45 = vmul.f32 0.041666668, %v1643_v44 }
 0x605   : > { %v1649_v46 = vpop.xlane.xlu1 %1648 }
 0x606   : > { %v1651_v47 = vmul.f32 %v1645_v45, %v1645_v45  ;;  %v1650_v48 = vmul.f32 0.041666668, %v1649_v46  ;;  %v1653_v51 = vsub.f32 %v1638_v32, %v1645_v45 }
 0x608   : > { %v1652_v49 = vsub.f32 %v1650_v48, %v1651_v47 }
 0x60a   : > { %v1654_v50 = vadd.f32 1e-05, %v1652_v49 }
 0x60c   : > { %2381 = vrsqrt.f32 %v1654_v50 }
 0x619   : > { %v2382_v52 = vpop.eup %2381 }
 0x61a   : > { %v1656_v54 = vmul.f32 %v2382_v52, %v1653_v51 }
 0x61c   : > { %v1663_v56 = vmul.f32 %v2119_v53, %v1656_v54 }
 0x61e   : > { %v1670_v57 = vadd.f32 %v2120_v55, %v1663_v56 }
 0x620   : > { %2264 = vmatmul.mubr.msk.f32.vlgmr.msra.gmra.mxu1 %vm663_vm1, %v1670_v57 }
 0x6e0   : > { %v1750_v62 = vpop.f32.mrf.mxu1 }
 0x6e1   : > { %v1751_v63 = vadd.f32 %v2121_v61, %v1750_v62 }
 0x6e2   : > { %v2265_v0 = vpop.f32.mrf.mxu1 }
 0x6e3   : > { %v1754_v1 = vmax.f32 %v1751_v63, 0.0 }
 0x6e5   : > { %2283 = vmatmul.mubr.msk.f32.vlgmr.msra.gmra.mxu0 %vm1770_vm6, %v1754_v1 }
 0x7a5   : > { %v1840_v4 = vpop.f32.mrf.mxu0 }
 0x7a6   : > { %v1841_v5 = vadd.f32 %v2123_v2, %v1840_v4 }
 0x7a7   : > { %v2284_v3 = vpop.f32.mrf.mxu0 }
 0x7a8   : > { %v1844_v6 = vadd.f32 %v1841_v5, %v1670_v57 }
 0x7aa   : > { %v1847_v8 = vsel %vm663_vm1, %v1844_v6, 0.0  ;;  %v1851_v9 = vmul.f32 %v1844_v6, %v1844_v6 }
 0x7ab   : > { %1848 = vadd.xlane.f32.xlu0 %v1847_v8 }
 0x7ac   : > { %v1852_v10 = vsel %vm663_vm1, %v1851_v9, 0.0 }
 0x7af   : > { %1853 = vadd.xlane.f32.xlu0 %v1852_v10 }
 0x834   : > { %v1849_v11 = vpop.xlane.xlu0 %1848 }
 0x835   : > { %v1850_v12 = vmul.f32 0.041666668, %v1849_v11 }
 0x837   : > { %v1856_v14 = vmul.f32 %v1850_v12, %v1850_v12  ;;  %v1858_v18 = vsub.f32 %v1844_v6, %v1850_v12 }
 0x838   : > { %v1854_v13 = vpop.xlane.xlu0 %1853 }
 0x839   : > { %v1855_v15 = vmul.f32 0.041666668, %v1854_v13 }
 0x83b   : > { %v1857_v16 = vsub.f32 %v1855_v15, %v1856_v14 }
 0x83d   : > { %v1859_v17 = vadd.f32 1e-05, %v1857_v16 }
 0x83f   : > { %2383 = vrsqrt.f32 %v1859_v17 }
 0x84c   : > { %v2384_v19 = vpop.eup %2383 }
 0x84d   : > { %v1861_v21 = vmul.f32 %v2384_v19, %v1858_v18 }
 0x84f   : > { %v1868_v23 = vmul.f32 %v2125_v20, %v1861_v21 }
 0x851   : > { %v1875_v24 = vadd.f32 %v2126_v22, %v1868_v23 }
 0x853   : > { %1876 = vst.msk [vmem:[%s2694_s26] sm:$0xff] %vm663_vm1, %v1875_v24 }
 0x854   : > { %2398 = shalt.err (!%p2395_p8)
}
 0x855   : > { %s2399_s16 = scalar_lea.hbm %s1889_s18, 128  ;;  %s2403_s21 = scalar_lea.hbm %s2976_s1, 256 }
 0x856   : > { %p2400_p10 = scmp.ne.s32.totalorder %s1889_s18, %s2399_s16  ;;  %p2404_p13 = scmp.lt.s32.totalorder %s1889_s18, %s2976_s1 }
 0x857   : > { %p2405_p0 = scmp.lt.s32.totalorder %s2403_s21, %s2399_s16 }
 0x858   : > { %p2401_p11 = pnand %p2400_p10, %p2607_p3 }
 0x859   : > { %p2406_p1 = por %p2405_p0, %p2404_p13 }
 0x85a   : > { %p2402_p12 = pneg %p2401_p11 }
 0x85c   : > { %p2407_p2 = pnand %p2406_p1, %p2402_p12 }
 0x85e   : > { %2410 = shalt.err (!%p2407_p2)
}
 0x85f   : > { %2286 = dma.vmem_to_hbm [thread:$0]  (%p2607_p3), %s1892_s20, 128, %s1889_s18, %s1878_s13  }
 0x860 PF: > { %s2978_s22 = sld [smem:[#allocation12_spill]] }
 0x861   : > { %s2979_s15 = sld [smem:[#allocation5_spill]] }
 0x866   : > { %p2292_p4 = scmp.ge.s32.totalorder %s2978_s22, 2 }
 0x867   : > { %s1903_s2 = sand.u32 1, %s2979_s15  }
 0x868   : > { %p2289_p5 = pnand %p2292_p4, %p2617_p9  ;;  %s1904_s3 = scalar_lea.sflag [#allocation3], %s1903_s2 }
 0x86a   : > { %p2290_p6 = pneg %p2289_p5 }
 0x86c   : > { %2444 = dma.done.wait (%p2290_p6), %s1904_s3, 128  }
 0x86d   : > { %2446 = vsyncadd (%p2290_p6), %s1904_s3, 4294967168  ;;  %s26_s15 = sadd.s32 1, %s2978_s22   ;;  %s2981_s25 = sld [smem:[#allocation6_spill]] }
 0x86e   : > { %p23_p7 = scmp.ge.s32.totalorder %s26_s15, 6   ;;  %s2982_s26 = sld [smem:[#allocation7_spill]] }
 0x86f   : > { %s2983_s27 = sld [smem:[#allocation17_spill]] }
 0x870   : > { %s2984_s28 = sld [smem:[#allocation10_spill]]  ;;  %25 = sbr.rel (!%p23_p7) target bundleno = 14 (0xe), region = 147 }
 0x871   : > { %s2985_s29 = sld [smem:[#allocation11_spill]] }
 0x872   : > { %s2986_s30 = sld [smem:[#allocation13_spill]] }
 0x873   : > { %s2987_s14 = sld [smem:[#allocation15_spill]] }
 0x875   :  { %1909 = vsyncpa [#allocation3], 1 }
 0x876   :  { %1911 = vsyncpa [#allocation3 + $0x1], 1 }

</bundles_post_ra>
